<compile_context>
chip_gen: v5e
topology: v5e:2x2
jax: 0.10.0
libtpu: 0.0.40
codegen_flags: <defaults>
</compile_context>

<pallas_src>
import math

import jax
import jax.numpy as jnp
from jax.experimental import pallas as pl
from jax.experimental.pallas import tpu as pltpu


# ---------------------------------------------------------------------------
# Tiling helpers
# ---------------------------------------------------------------------------
def _round_up(x, m):
    return ((x + m - 1) // m) * m


def _largest_divisor(n, candidates):
    for c in candidates:
        if n % c == 0:
            return c
    return candidates[-1]


def _feature_tiling(size_in, size_out):
    """Padded feature dims + lane-aligned tile sizes (independent of batch)."""
    In_p = _round_up(size_in, 128)
    Out_p = _round_up(size_out, 128)
    # Big reduction tiles amortize per-grid-step overhead; prefer 256-multiples
    # for TN (v6e/v7x 256-wide MXU), fall back to 128.
    TK = _largest_divisor(In_p, (2048, 1024, 512, 256, 128))
    TN = _largest_divisor(Out_p, (512, 256, 128))
    return In_p, Out_p, TK, TN


def _batch_tiling(B):
    """Keep the whole batch in one i-tile when it fits (weights stream once)."""
    B_p = _round_up(B, 8)
    if B_p <= 256:
        return B_p, B_p
    B_p = _round_up(B, 256)
    return B_p, 256


# ---------------------------------------------------------------------------
# Kernel
# ---------------------------------------------------------------------------
def ldr_kernel(x_ref, a_ref, wt_ref, b_ref, Wd_ref, o_ref, acc_ref, corr_ref):
    """Fused LDR layer: tiled GEMM + bias + linear-decision-rule correction.

    Grid = (i: B tiles, j: Out tiles, k: In reduction tiles), k innermost.

    x_ref  : (TB, TK)         bf16 features tile
    a_ref  : (TB, A)          f32 missing-data binaries (resident per i tile)
    wt_ref : (TK, TN)         bf16 pre-transposed weight tile (weight.T)
    b_ref  : (1,  TN)         f32 bias tile
    Wd_ref : (TK, A)          bf16 decision-rule weight tile
    o_ref  : (TB, TN)         f32 output tile
    acc_ref: (TB, TN) scratch f32 GEMM accumulator (per (i, j), reset at k==0)
    corr_ref:(TB, 1)  scratch f32 correction (per i, computed only at j==0)
    """
    j = pl.program_id(1)
    k = pl.program_id(2)

    @pl.when(k == 0)
    def _init_acc():
        # Seed the accumulator with the broadcast bias: removes one (TB, TN)
        # add + vreg traffic from the finalize step.
        acc_ref[...] = jnp.broadcast_to(b_ref[...], acc_ref.shape)

    @pl.when((j == 0) & (k == 0))
    def _init_corr():
        corr_ref[...] = jnp.zeros_like(corr_ref)

    x = x_ref[...]                                               # (TB, TK) bf16
    # Main GEMM partial: x_tile @ weight.T_tile on the MXU, f32 accumulation.
    acc_ref[...] += jnp.dot(x, wt_ref[...],
                            preferred_element_type=jnp.float32)  # (TB, TN)

    # Correction partial only on the first Out tile; it only depends on (i, k)
    # and the corr scratch persists across the j axis of the same i tile.
    @pl.when(j == 0)
    def _corr():
        xW = jnp.dot(x, Wd_ref[...],
                     preferred_element_type=jnp.float32)          # (TB, A)
        corr_ref[...] += jnp.sum(xW * a_ref[...], axis=1, keepdims=True)

    @pl.when(k == pl.num_programs(2) - 1)
    def _finalize():
        o_ref[...] = (acc_ref[...] + corr_ref[...]).astype(o_ref.dtype)


# ---------------------------------------------------------------------------
# Parameter preparation (call once at init time, NOT per forward call)
# ---------------------------------------------------------------------------
def prepare_ldr_params(weight, bias, W, *, compute_dtype=jnp.bfloat16):
    """Pad, pre-transpose and pre-cast the layer parameters.

    weight: (size_out, size_in), bias: (size_out,), W: (size_in, dim_alpha).
    Returns (wt_p, b_p, W_p, (size_in, size_out, dim_alpha)) where
      wt_p: (In_p, Out_p)      compute_dtype  == padded weight.T
      b_p : (1, Out_p)         float32
      W_p : (In_p, dim_alpha)  compute_dtype
    """
    size_out, size_in = weight.shape
    dim_alpha = W.shape[1]
    In_p, Out_p, _, _ = _feature_tiling(size_in, size_out)

    wt_p = jnp.zeros((In_p, Out_p), compute_dtype).at[:size_in, :size_out].set(
        weight.T.astype(compute_dtype))
    b_p = jnp.zeros((1, Out_p), jnp.float32).at[0, :size_out].set(
        bias.astype(jnp.float32))
    W_p = jnp.zeros((In_p, dim_alpha), compute_dtype).at[:size_in, :].set(
        W.astype(compute_dtype))
    return wt_p, b_p, W_p, (size_in, size_out, dim_alpha)


# ---------------------------------------------------------------------------
# Forward wrapper
# ---------------------------------------------------------------------------
def ldr_layer(x, a, params):
    wt_p, b_p, W_p, (size_in, size_out, dim_alpha) = params
    compute_dtype = wt_p.dtype
    B = x.shape[0]
    assert x.shape == (B, size_in)
    assert a.shape == (B, dim_alpha)

    In_p, Out_p, TK, TN = _feature_tiling(size_in, size_out)
    B_p, TB = _batch_tiling(B)

    # Pad activations only when the shapes don't already match the tiling
    # (padding is an extra HBM pass over x). Zero padding contributes nothing
    # to either term; padded rows/cols are sliced off afterwards.
    xc = x.astype(compute_dtype)
    if (B_p, In_p) != (B, size_in):
        x_p = jnp.zeros((B_p, In_p), compute_dtype).at[:B, :size_in].set(xc)
    else:
        x_p = xc
    ac = a.astype(jnp.float32)
    if B_p != B:
        a_p = jnp.zeros((B_p, dim_alpha), jnp.float32).at[:B, :].set(ac)
    else:
        a_p = ac

    grid = (B_p // TB, Out_p // TN, In_p // TK)

    # Explicit VMEM budget (double-buffered tiles + scratch) -> vmem_limit_bytes
    # so larger tiles stay safe on v7x (64 MiB physical / 32 MiB scoped default).
    itm = jnp.dtype(compute_dtype).itemsize
    vmem_bytes = (
        2 * (TB * TK * itm + TB * dim_alpha * 4 + TK * TN * itm
             + TN * 4 + TK * dim_alpha * itm)       # double-buffered inputs
        + 2 * TB * TN * 4                           # double-buffered output
        + TB * TN * 4 + TB * 4)                     # acc + corr scratch
    vmem_limit = int(min(64 * 1024 * 1024,
                         max(32 * 1024 * 1024, int(vmem_bytes * 1.5))))

    cost = pl.CostEstimate(
        flops=2 * B_p * Out_p * In_p + 2 * B_p * dim_alpha * In_p,
        transcendentals=0,
        bytes_accessed=(x_p.size * itm + a_p.size * 4 + wt_p.size * itm
                        + b_p.size * 4 + W_p.size * itm + B_p * Out_p * 4),
    )

    out_p = pl.pallas_call(
        ldr_kernel,
        out_shape=jax.ShapeDtypeStruct((B_p, Out_p), jnp.float32),
        grid_spec=pltpu.PrefetchScalarGridSpec(
            num_scalar_prefetch=0,
            grid=grid,
            in_specs=[
                # x: depends on (B tile, K tile)
                pl.BlockSpec((TB, TK), lambda i, j, k: (i, k)),
                # a: depends only on B tile -> resident, no re-DMA per j/k
                pl.BlockSpec((TB, dim_alpha), lambda i, j, k: (i, 0)),
                # weight.T: depends on (K tile, Out tile)
                pl.BlockSpec((TK, TN), lambda i, j, k: (k, j)),
                # bias: depends only on Out tile
                pl.BlockSpec((1, TN), lambda i, j, k: (0, j)),
                # W (decision rule): depends only on K tile
                pl.BlockSpec((TK, dim_alpha), lambda i, j, k: (k, 0)),
            ],
            out_specs=pl.BlockSpec((TB, TN), lambda i, j, k: (i, j)),
            scratch_shapes=[
                pltpu.VMEM((TB, TN), jnp.float32),   # GEMM accumulator
                pltpu.VMEM((TB, 1), jnp.float32),    # correction accumulator
            ],
        ),
        # j carries the cross-iteration corr dependence (computed at j==0,
        # reused for j>0 of the same i) -> must be "arbitrary". Only the batch
        # axis i is "parallel" (v7x megacore shards over batch tiles).
        compiler_params=pltpu.CompilerParams(
            dimension_semantics=("parallel", "arbitrary", "arbitrary"),
            vmem_limit_bytes=vmem_limit,
        ),
        cost_estimate=cost,
    )(x_p, a_p, wt_p, b_p, W_p)

    if (B_p, Out_p) != (B, size_out):
        return out_p[:B, :size_out]
    return out_p


# ---------------------------------------------------------------------------
# Init + reference (mirrors the PyTorch module)
# ---------------------------------------------------------------------------
def init_params(key, size_in, size_out, dim_alpha):
    """kaiming_uniform_(a=sqrt(5)) -> bound = 1/sqrt(fan_in); W starts at 0."""
    k_w, k_b = jax.random.split(key)
    bound = 1.0 / math.sqrt(size_in)
    weight = jax.random.uniform(k_w, (size_out, size_in), jnp.float32,
                                minval=-bound, maxval=bound)
    bias = jax.random.uniform(k_b, (size_out,), jnp.float32,
                              minval=-bound, maxval=bound)
    W = jnp.zeros((size_in, dim_alpha), jnp.float32)
    return weight, bias, W


def ldr_reference(x, a, weight, bias, W):
    return (x @ weight.T) + bias[None, :] + jnp.sum((a @ W.T) * x,
                                                    axis=1, keepdims=True)


if __name__ == "__main__":
    B, size_in, size_out, dim_alpha = 8, 32, 16, 4

    key = jax.random.PRNGKey(0)
    k_x, k_a, k_p, k_w2 = jax.random.split(key, 4)

    x = jax.random.normal(k_x, (B, size_in), jnp.float32)
    a = (jax.random.uniform(k_a, (B, dim_alpha)) > 0.5).astype(jnp.float32)

    weight, bias, W = init_params(k_p, size_in, size_out, dim_alpha)
    # Make W nonzero so the correction term is actually exercised.
    W = 0.01 * jax.random.normal(k_w2, (size_in, dim_alpha), jnp.float32)

    # One-time parameter preparation (pad + transpose + bf16 cast).
    params = prepare_ldr_params(weight, bias, W, compute_dtype=jnp.bfloat16)

    out = ldr_layer(x, a, params)
    out = jax.block_until_ready(out)

    # Reference computed with the same bf16 input rounding (the kernel
    # accumulates in f32), so the check validates the kernel itself rather
    # than bf16 quantization error vs the f32 PyTorch weights.
    bf = lambda t: t.astype(jnp.bfloat16).astype(jnp.float32)
    ref = ldr_reference(bf(x), a, bf(weight), bias, bf(W))

    assert out.shape == (B, size_out)
    assert jnp.allclose(out, ref, atol=1e-4, rtol=1e-4), "mismatch vs reference"

    print("KERNEL_OK")
</pallas_src>

<mosaic_0001>
module attributes {stable_mosaic.version = 11 : i64} {
  func.func @ldr_kernel(%arg0: i32, %arg1: i32, %arg2: i32, %arg3: memref<8x128xbf16, #tpu.memory_space<vmem>>, %arg4: memref<8x4xf32, #tpu.memory_space<vmem>>, %arg5: memref<128x128xbf16, #tpu.memory_space<vmem>>, %arg6: memref<1x128xf32, #tpu.memory_space<vmem>>, %arg7: memref<128x4xbf16, #tpu.memory_space<vmem>>, %arg8: memref<8x128xf32, #tpu.memory_space<vmem>>, %arg9: memref<8x128xf32, #tpu.memory_space<vmem>>, %arg10: memref<8x1xf32, #tpu.memory_space<vmem>>) attributes {dimension_semantics = [#tpu.dimension_semantics<parallel>, #tpu.dimension_semantics<arbitrary>, #tpu.dimension_semantics<arbitrary>], iteration_bounds = array<i64: 1, 1, 1>, scalar_prefetch = 0 : i64, scratch_operands = 2 : i64, tpu.core_type = #tpu.core_type<tc>, window_params = [{transform_indices = @transform_0, window_bounds = array<i64: 8, 128>}, {transform_indices = @transform_1, window_bounds = array<i64: 8, 4>}, {transform_indices = @transform_2, window_bounds = array<i64: 128, 128>}, {transform_indices = @transform_3, window_bounds = array<i64: 1, 128>}, {transform_indices = @transform_4, window_bounds = array<i64: 128, 4>}, {transform_indices = @transform_5, window_bounds = array<i64: 8, 128>}]} {
    %c0_i32 = arith.constant 0 : i32
    %0 = arith.cmpi eq, %arg2, %c0_i32 : i32
    %1 = arith.extui %0 : i1 to i32
    %c0_i32_0 = arith.constant 0 : i32
    %2 = arith.cmpi ne, %1, %c0_i32_0 : i32
    scf.if %2 {
      %c0_15 = arith.constant 0 : index
      %c0_16 = arith.constant 0 : index
      %20 = vector.load %arg6[%c0_15, %c0_16] : memref<1x128xf32, #tpu.memory_space<vmem>>, vector<1x128xf32>
      %21 = vector.shape_cast %20 : vector<1x128xf32> to vector<1x128xf32>
      %22 = vector.broadcast %21 : vector<1x128xf32> to vector<8x128xf32>
      %c0_17 = arith.constant 0 : index
      %c0_18 = arith.constant 0 : index
      %23 = vector.load %arg9[%c0_17, %c0_18] : memref<8x128xf32, #tpu.memory_space<vmem>>, vector<8x128xf32>
      tpu.vector_store %arg9[%c0_17, %c0_18], %22 {strides = array<i32>} : memref<8x128xf32, #tpu.memory_space<vmem>>, vector<8x128xf32>,
    } else {
    }
    %c0_i32_1 = arith.constant 0 : i32
    %3 = arith.cmpi eq, %arg1, %c0_i32_1 : i32
    %c0_i32_2 = arith.constant 0 : i32
    %4 = arith.cmpi eq, %arg2, %c0_i32_2 : i32
    %5 = arith.andi %3, %4 : i1
    %6 = arith.extui %5 : i1 to i32
    %c0_i32_3 = arith.constant 0 : i32
    %7 = arith.cmpi ne, %6, %c0_i32_3 : i32
    scf.if %7 {
      %cst_15 = arith.constant 0.000000e+00 : f32
      %20 = vector.broadcast %cst_15 : f32 to vector<8x1xf32>
      %c0_16 = arith.constant 0 : index
      %c0_17 = arith.constant 0 : index
      %21 = vector.load %arg10[%c0_16, %c0_17] : memref<8x1xf32, #tpu.memory_space<vmem>>, vector<8x1xf32>
      tpu.vector_store %arg10[%c0_16, %c0_17], %20 {strides = array<i32>} : memref<8x1xf32, #tpu.memory_space<vmem>>, vector<8x1xf32>,
    } else {
    }
    %c0 = arith.constant 0 : index
    %c0_4 = arith.constant 0 : index
    %8 = vector.load %arg3[%c0, %c0_4] : memref<8x128xbf16, #tpu.memory_space<vmem>>, vector<8x128xbf16>
    %c0_5 = arith.constant 0 : index
    %c0_6 = arith.constant 0 : index
    %9 = vector.load %arg9[%c0_5, %c0_6] : memref<8x128xf32, #tpu.memory_space<vmem>>, vector<8x128xf32>
    %c0_7 = arith.constant 0 : index
    %c0_8 = arith.constant 0 : index
    %10 = vector.load %arg5[%c0_7, %c0_8] : memref<128x128xbf16, #tpu.memory_space<vmem>>, vector<128x128xbf16>
    %cst = arith.constant dense<0.000000e+00> : vector<8x128xf32>
    %11 = tpu.matmul %8, %10, %cst {dimension_numbers = #tpu.dot_dimension_numbers<[1], [0], [0], [1], [0, 0, 1, 1], [], []>} : vector<8x128xbf16>, vector<128x128xbf16>, vector<8x128xf32> -> vector<8x128xf32>
    %12 = arith.addf %9, %11 : vector<8x128xf32>
    %c0_9 = arith.constant 0 : index
    %c0_10 = arith.constant 0 : index
    %13 = vector.load %arg9[%c0_9, %c0_10] : memref<8x128xf32, #tpu.memory_space<vmem>>, vector<8x128xf32>
    tpu.vector_store %arg9[%c0_9, %c0_10], %12 {strides = array<i32>} : memref<8x128xf32, #tpu.memory_space<vmem>>, vector<8x128xf32>,
    %c0_i32_11 = arith.constant 0 : i32
    %14 = arith.cmpi eq, %arg1, %c0_i32_11 : i32
    %15 = arith.extui %14 : i1 to i32
    %c0_i32_12 = arith.constant 0 : i32
    %16 = arith.cmpi ne, %15, %c0_i32_12 : i32
    scf.if %16 {
      %c0_15 = arith.constant 0 : index
      %c0_16 = arith.constant 0 : index
      %20 = vector.load %arg7[%c0_15, %c0_16] : memref<128x4xbf16, #tpu.memory_space<vmem>>, vector<128x4xbf16>
      %cst_17 = arith.constant dense<0.000000e+00> : vector<8x4xf32>
      %21 = tpu.matmul %8, %20, %cst_17 {dimension_numbers = #tpu.dot_dimension_numbers<[1], [0], [0], [1], [0, 0, 1, 1], [], []>} : vector<8x128xbf16>, vector<128x4xbf16>, vector<8x4xf32> -> vector<8x4xf32>
      %c0_18 = arith.constant 0 : index
      %c0_19 = arith.constant 0 : index
      %22 = vector.load %arg10[%c0_18, %c0_19] : memref<8x1xf32, #tpu.memory_space<vmem>>, vector<8x1xf32>
      %c0_20 = arith.constant 0 : index
      %c0_21 = arith.constant 0 : index
      %23 = vector.load %arg4[%c0_20, %c0_21] : memref<8x4xf32, #tpu.memory_space<vmem>>, vector<8x4xf32>
      %24 = arith.mulf %21, %23 : vector<8x4xf32>
      %cst_22 = arith.constant dense<0.000000e+00> : vector<8xf32>
      %25 = vector.multi_reduction <add>, %24, %cst_22 [1] : vector<8x4xf32> to vector<8xf32>
      %26 = vector.shape_cast %25 : vector<8xf32> to vector<8x1xf32>
      %27 = arith.addf %22, %26 : vector<8x1xf32>
      %c0_23 = arith.constant 0 : index
      %c0_24 = arith.constant 0 : index
      %28 = vector.load %arg10[%c0_23, %c0_24] : memref<8x1xf32, #tpu.memory_space<vmem>>, vector<8x1xf32>
      tpu.vector_store %arg10[%c0_23, %c0_24], %27 {strides = array<i32>} : memref<8x1xf32, #tpu.memory_space<vmem>>, vector<8x1xf32>,
    } else {
    }
    %c0_i32_13 = arith.constant 0 : i32
    %17 = arith.cmpi eq, %arg2, %c0_i32_13 : i32
    %18 = arith.extui %17 : i1 to i32
    %c0_i32_14 = arith.constant 0 : i32
    %19 = arith.cmpi ne, %18, %c0_i32_14 : i32
    scf.if %19 {
      %c0_15 = arith.constant 0 : index
      %c0_16 = arith.constant 0 : index
      %20 = vector.load %arg9[%c0_15, %c0_16] : memref<8x128xf32, #tpu.memory_space<vmem>>, vector<8x128xf32>
      %c0_17 = arith.constant 0 : index
      %c0_18 = arith.constant 0 : index
      %21 = vector.load %arg10[%c0_17, %c0_18] : memref<8x1xf32, #tpu.memory_space<vmem>>, vector<8x1xf32>
      %22 = vector.broadcast %21 : vector<8x1xf32> to vector<8x128xf32>
      %23 = arith.addf %20, %22 : vector<8x128xf32>
      %c0_19 = arith.constant 0 : index
      %c0_20 = arith.constant 0 : index
      %24 = vector.load %arg8[%c0_19, %c0_20] : memref<8x128xf32, #tpu.memory_space<vmem>>, vector<8x128xf32>
      tpu.vector_store %arg8[%c0_19, %c0_20], %23 {strides = array<i32>} : memref<8x128xf32, #tpu.memory_space<vmem>>, vector<8x128xf32>,
    } else {
    }
    return
  }
  func.func @transform_0(%arg0: i32, %arg1: i32, %arg2: i32) -> (i32, i32) {
    %c0_i32 = arith.constant 0 : i32
    return %arg0, %arg2 : i32, i32
  }
  func.func @transform_1(%arg0: i32, %arg1: i32, %arg2: i32) -> (i32, i32) {
    %c0_i32 = arith.constant 0 : i32
    %c0_i32_0 = arith.constant 0 : i32
    return %arg0, %c0_i32 : i32, i32
  }
  func.func @transform_2(%arg0: i32, %arg1: i32, %arg2: i32) -> (i32, i32) {
    %c0_i32 = arith.constant 0 : i32
    return %arg2, %arg1 : i32, i32
  }
  func.func @transform_3(%arg0: i32, %arg1: i32, %arg2: i32) -> (i32, i32) {
    %c0_i32 = arith.constant 0 : i32
    %c0_i32_0 = arith.constant 0 : i32
    return %c0_i32, %arg1 : i32, i32
  }
  func.func @transform_4(%arg0: i32, %arg1: i32, %arg2: i32) -> (i32, i32) {
    %c0_i32 = arith.constant 0 : i32
    %c0_i32_0 = arith.constant 0 : i32
    return %arg2, %c0_i32 : i32, i32
  }
  func.func @transform_5(%arg0: i32, %arg1: i32, %arg2: i32) -> (i32, i32) {
    %c0_i32 = arith.constant 0 : i32
    return %arg0, %arg1 : i32, i32
  }
}

</mosaic_0001>

<bundles_post_ra>
// kernel: tpu_custom_call.1
= control target key start
LH: loop header
LB: loop body
LE: loop exit
PB: predicated region body
PF: predicated region fallthrough
CT: control target
= control target key end

     0   :  { %s440_s0 = inlined_call_operand.vmem [shape: bf16[8,128], index: 0, kind: input, shape index: {}]   ;;  %s441_s1 = inlined_call_operand.vmem [shape: f32[8,4], index: 1, kind: input, shape index: {}]   ;;  %s442_s2 = inlined_call_operand.vmem [shape: bf16[128,128], index: 2, kind: input, shape index: {}]   ;;  %s443_s3 = inlined_call_operand.vmem [shape: f32[1,128], index: 3, kind: input, shape index: {}]   ;;  %s444_s4 = inlined_call_operand.vmem [shape: bf16[128,4], index: 4, kind: input, shape index: {}]   ;;  %s445_s5 = inlined_call_operand.hbm [shape: f32[8,128], index: 5, kind: output, shape index: {}]  }
   0x1   :  { %v315_v0 = vld [vmem:[%s444_s4 + $0x38] sm:$0xff]  ;;  %v314_v1 = vld [vmem:[%s444_s4 + $0x30] sm:$0xff] }
   0x2   :  { %185 = vmatpush.bf16.msra.mxu1 %v315_v0 }
   0x3   :  { %10 = vsyncpa [#allocation5], 0  ;;  %v313_v2 = vld [vmem:[%s444_s4 + $0x28] sm:$0xff]  ;;  %v312_v3 = vld [vmem:[%s444_s4 + $0x20] sm:$0xff]  ;;  %vm201_vm0 = vcmask 31744   ;;  %vm35_vm1 = vcmask 7168  }
   0x4   :  { %v311_v4 = vld [vmem:[%s444_s4 + $0x18] sm:$0xff]  ;;  %v310_v5 = vld [vmem:[%s444_s4 + $0x10] sm:$0xff]  ;;  %v309_v6 = vld [vmem:[%s444_s4 + $0x8] sm:$0xff]  ;;  %v347_v22 = vmov 0.0   ;;  %v348_v23 = vmov 0   ;;  %s349_s27 = smov [#allocation4]  }
   0x5   :  { %v308_v7 = vld [vmem:[%s444_s4] sm:$0xff]  ;;  %v307_v9 = vld [vmem:[%s442_s2 + $0x38] sm:$0xff]  ;;  %v306_v10 = vld [vmem:[%s442_s2 + $0x30] sm:$0xff]  ;;  %36 = vst.msk [vmem:[#allocation3] sm:$0xff] %vm35_vm1, %v347_v22  ;;  %319 = vset.pattern.permute.xlu0 %v348_v23  ;;  %s225_s28 = sshll.u32 %s349_s27, 4  ;;  %s227_s6 = sshll.u32 %s445_s5, 4  ;;  %s226_s28 = int_to_ptr.vmem [resolvable:$true] %s225_s28  ;;  %s228_s6 = int_to_ptr.hbm [resolvable:$true] %s227_s6 }
   0x6   :  { %186 = vmatpush.bf16.msra.mxu1 %v314_v1  ;;  %v37_v8 = vld [vmem:[%s440_s0] sm:$0xf]  ;;  %103 = vmatpush.bf16.msra.mxu0 %v307_v9  ;;  %v305_v11 = vld [vmem:[%s442_s2 + $0x28] sm:$0xff]  ;;  %v303_v13 = vld [vmem:[%s442_s2 + $0x18] sm:$0xff] }
   0x7   :  { %v304_v12 = vld [vmem:[%s442_s2 + $0x20] sm:$0xff]  ;;  %v302_v14 = vld [vmem:[%s442_s2 + $0x10] sm:$0xff]  ;;  %v301_v16 = vld [vmem:[%s442_s2 + $0x8] sm:$0xff] }
   0x8   :  { %v199_v15 = vld [vmem:[%s441_s1] sm:$0xff] }
   0x9   :  { %v300_v19 = vld [vmem:[%s442_s2] sm:$0xff] }
   0xa   :  { %187 = vmatpush.bf16.msra.mxu1 %v313_v2  ;;  %104 = vmatpush.bf16.msra.mxu0 %v306_v10  ;;  %v320_v30 = vld [vmem:[%s443_s3] ss:$0 sm:$0xff] }
   0xc   :  { %v198_v24 = vld [vmem:[#allocation3] sm:$0xff] }
   0xe   :  { %188 = vmatpush.bf16.msra.mxu1 %v312_v3  ;;  %105 = vmatpush.bf16.msra.mxu0 %v305_v11 }
  0x12   :  { %189 = vmatpush.bf16.msra.mxu1 %v311_v4  ;;  %106 = vmatpush.bf16.msra.mxu0 %v304_v12 }
  0x16   :  { %190 = vmatpush.bf16.msra.mxu1 %v310_v5  ;;  %107 = vmatpush.bf16.msra.mxu0 %v303_v13 }
  0x1a   :  { %191 = vmatpush.bf16.msra.mxu1 %v309_v6  ;;  %108 = vmatpush.bf16.msra.mxu0 %v302_v14 }
  0x1e   :  { %192 = vmatpush.bf16.msra.mxu1 %v308_v7  ;;  %109 = vmatpush.bf16.msra.mxu0 %v301_v16 }
  0x21   :  { %193 = vmatmul.bf16.vlgmr.msra.gmra.mxu1 %v37_v8 }
  0x22   :  { %110 = vmatpush.bf16.msra.mxu0 %v300_v19 }
  0x25   :  { %111 = vmatmul.bf16.vlgmr.msra.gmra.mxu0 %v37_v8 }
  0x9e   :  { %v194_v17 = vpop.f32.mrf.mxu1 }
  0x9f   :  { %v200_v18 = vmul.f32 %v199_v15, %v194_v17 }
  0xa1   :  { %v202_v20 = vsel %vm201_vm0, %v200_v18, 0.0 }
  0xa2   :  { %203 = vadd.xlane.f32.xlu0 %v202_v20  ;;  %v112_v28 = vpop.f32.mrf.mxu0 }
  0xa3   :  { %v116_v31 = vadd.f32 %v320_v30, %v112_v28 }
  0xa6   :  { %v196_v21 = vpop.f32.mrf.mxu1 }
  0xaa   :  { %v114_v29 = vpop.f32.mrf.mxu0 }
 0x115   :  { %v204_v25 = vpop.xlane.xlu0 %203 }
 0x116   :  { %v205_v26 = vadd.f32 %v204_v25, %v198_v24 }
 0x118   :  { %207 = vst.msk [vmem:[#allocation3] sm:$0xff] %vm35_vm1, %v205_v26 }
 0x11f   :  { %v212_v27 = vld [vmem:[#allocation3] sm:$0xff] }
 0x120   :  { %215 = vperm.xlu0 %319, %v212_v27  }
 0x192   :  { %v216_v32 = vpop.permute.xlu0 %215 }
 0x193   :  { %v218_v33 = vadd.f32 %v216_v32, %v116_v31 }
 0x195   :  { %219 = vst [vmem:[#allocation4] sm:$0xff] %v218_v33 }
 0x196   :  { %230 = dma.vmem_to_hbm [thread:$0]  %s226_s28, 128, %s228_s6, [#allocation5]  }
 0x197   :  { %345 = dma.done.wait [#allocation5], 128  }
 0x198   :  { %346 = vsyncadd [#allocation5], 4294967168 }
 0x199   :  { %235 = vsyncpa [#allocation5], 1 }

</bundles_post_ra>
